<compile_context>
chip_gen: v6e
topology: v6e:2x2x1
jax: 0.10.0
libtpu: 0.0.40
codegen_flags: <defaults>
</compile_context>

<pallas_src>
import functools

import jax
import jax.numpy as jnp
from jax.experimental import pallas as pl
from jax.experimental.pallas import tpu as pltpu

_MIB = 1024 * 1024


def _swap_last_two(x):
    # Lane-layout-aware transpose of the last two dims (XLU slot, otherwise idle
    # here). Falls back to jnp.transpose when einshape is not present.
    if hasattr(pltpu, "einshape"):
        return pltpu.einshape("beh->bhe", x)
    return jnp.transpose(x, (0, 2, 1))


def patch_embed_kernel(x_ref, cls_ref, pos_ref, o_ref):
    # x_ref:   (Bt, E, HW)  -- Bt batch elements, channel-major patch maps
    # cls_ref: (1, E)       -- learned cls token (same block every step -> resident)
    # pos_ref: (P, E)       -- learned positional embeddings (resident)
    # o_ref:   (Bt, P, E)   -- output sequences for this batch block
    bt, e, hw = x_ref.shape

    pos = pos_ref[...]                                    # (P, E)
    xt = _swap_last_two(x_ref[...])                       # (Bt, HW, E)

    # Fold the positions add into the concat operands so the final values are
    # produced (and stored) in one pass over the block.
    cls_row = (cls_ref[...] + pos[0:1, :])[None, :, :]    # (1, 1, E)
    cls_rows = jnp.broadcast_to(cls_row, (bt, 1, e))      # (Bt, 1, E)
    patches = xt + pos[1:, :][None, :, :]                 # (Bt, HW, E)

    # TODO(synk): if a bundle dump shows the XLU (transpose + 1-row concat shift)
    # as the binding slot on v7x, negotiate a cls-token-last / padded-P layout so
    # patches stay sublane-aligned and the cls row is one small masked store.
    out = jnp.concatenate([cls_rows, patches], axis=1)    # (Bt, P, E)
    o_ref[...] = out.astype(o_ref.dtype)


@functools.lru_cache(maxsize=None)
def _vmem_budget_config():
    """Generation-dependent VMEM budgets, leaving headroom for compiler scratch."""
    vmem_cap = None
    try:
        vmem_cap = getattr(pltpu.get_tpu_info(), "vmem_capacity_bytes", None)
    except Exception:
        vmem_cap = None
    if vmem_cap is None:
        vmem_cap = 64 * _MIB  # conservative: assume the smallest (v7x-sized) VMEM
    if vmem_cap >= 100 * _MIB:
        # v5e / v6e: 128 MiB VMEM, single TensorCore -> big blocks, serial grid.
        return {"block_budget": 88 * _MIB, "vmem_limit": 112 * _MIB, "multi_tc": False}
    # v7x: 64 MiB per TC, 2 TCs per chip -> headroom + >=2 grid steps.
    return {"block_budget": 36 * _MIB, "vmem_limit": 56 * _MIB, "multi_tc": True}


def _batch_tile_cap(B, E, HW, P, itemsize, out_itemsize, block_budget, multi_tc):
    # Per batch element:
    #   - double-buffered input + output pipeline blocks,
    #   - the in-kernel temporaries (transposed patches + concatenated slab):
    #     far too big for 64 vregs, so Mosaic materializes them in VMEM.
    per_elem = (2 * E * HW * itemsize               # x block (double-buffered)
                + 2 * P * E * out_itemsize          # out block (double-buffered)
                + 2 * P * E * max(itemsize, 4))     # xt + concat temporaries
    resident = 2 * (P * E + E) * itemsize           # cls + pos resident tiles
    cap = max(1, (block_budget - resident) // per_elem)
    if multi_tc and B >= 2:
        # Keep at least 2 grid steps so ("parallel",) can split across both TCs.
        cap = min(cap, max(1, B // 2))
    return min(cap, B)


def _tile_and_pad(B, cap):
    # Prefer an exact divisor of B (no padded HBM traffic); fall back to padding
    # when the best divisor is pathologically small (e.g. prime B -> Bt would be 1).
    best = 1
    for d in range(min(B, cap), 0, -1):
        if B % d == 0:
            best = d
            break
    bt = best if (best == B or best * 2 >= cap) else cap
    b_pad = pl.cdiv(B, bt) * bt
    return bt, b_pad


@functools.partial(jax.jit, static_argnames=("out_dtype",))
def patch_embedding(x, cls_token, positions, *, out_dtype=None):
    """x: (B, E, H, W); cls_token: (1, 1, E); positions: (HW+1, E).

    out_dtype: set to jnp.bfloat16 in production to cut ~1/3 of HBM traffic on
    this memory-bound kernel; default keeps x.dtype (exact PyTorch semantics).
    """
    B, E, H, W = x.shape
    HW = H * W
    P = HW + 1
    # The PyTorch Rearrange 'b e (h) (w) -> b (h w) e' implies channels == emb_size.
    assert positions.shape == (P, E), (positions.shape, (P, E))
    assert cls_token.shape[-1] == E, (cls_token.shape, E)

    out_dtype = jnp.dtype(x.dtype) if out_dtype is None else jnp.dtype(out_dtype)
    itemsize = jnp.dtype(x.dtype).itemsize
    out_itemsize = out_dtype.itemsize

    cfg = _vmem_budget_config()
    cap = _batch_tile_cap(B, E, HW, P, itemsize, out_itemsize,
                          cfg["block_budget"], cfg["multi_tc"])
    Bt, B_pad = _tile_and_pad(B, cap)

    x_flat = x.reshape(B, E, HW)        # glue: flatten spatial dims (row-major h,w)
    if B_pad != B:
        x_flat = jnp.pad(x_flat, ((0, B_pad - B), (0, 0), (0, 0)))
    cls2d = cls_token.reshape(1, E)     # glue: drop singleton dims

    grid = (B_pad // Bt,)

    # Memory-bound custom call: tell XLA so it can schedule neighbors around it.
    cost = pl.CostEstimate(
        flops=0,
        transcendentals=0,
        bytes_accessed=int(B_pad * E * HW * itemsize
                           + B_pad * P * E * out_itemsize
                           + (P * E + E) * itemsize),
    )

    # TODO(synk): for production ViT, guarantee E % 128 == 0 (e.g. 768) so the
    # output last dim is lane-dense; the demo E=32 gives masked stores.
    out = pl.pallas_call(
        patch_embed_kernel,
        out_shape=jax.ShapeDtypeStruct((B_pad, P, E), out_dtype),
        grid_spec=pltpu.PrefetchScalarGridSpec(
            num_scalar_prefetch=0,
            grid=grid,
            in_specs=[
                pl.BlockSpec((Bt, E, HW), lambda b: (b, 0, 0)),
                pl.BlockSpec((1, E), lambda b: (0, 0)),
                pl.BlockSpec((P, E), lambda b: (0, 0)),
            ],
            out_specs=pl.BlockSpec((Bt, P, E), lambda b: (b, 0, 0)),
        ),
        compiler_params=pltpu.CompilerParams(
            dimension_semantics=("parallel",),
            vmem_limit_bytes=cfg["vmem_limit"],
        ),
        cost_estimate=cost,
    )(x_flat, cls2d, positions)

    return out[:B] if B_pad != B else out


if __name__ == "__main__":
    # Small shapes consistent with the module:
    #   emb_size=32, img_size=16, patch_size=4 -> num_patches = (16//4)^2 = 16
    #   input x: (B=2, E=32, H=4, W=4)  (channels must equal emb_size, see note)
    B, E, H, W = 2, 32, 4, 4
    P = H * W + 1

    key = jax.random.PRNGKey(0)
    kx, kcls, kpos = jax.random.split(key, 3)
    x = jax.random.normal(kx, (B, E, H, W), dtype=jnp.float32)
    cls_token = jax.random.normal(kcls, (1, 1, E), dtype=jnp.float32)  # ~ torch.randn
    positions = jax.random.normal(kpos, (P, E), dtype=jnp.float32)     # ~ torch.randn

    out = patch_embedding(x, cls_token, positions)
    out = jax.block_until_ready(out)

    # Pure-JAX reference for sanity
    x_re = jnp.transpose(x.reshape(B, E, H * W), (0, 2, 1))            # b (h w) e
    cls_b = jnp.broadcast_to(cls_token, (B, 1, E))
    ref = jnp.concatenate([cls_b, x_re], axis=1) + positions[None]

    assert out.shape == (B, P, E), out.shape
    assert jnp.allclose(out, ref, atol=1e-6, rtol=1e-6)
    print("KERNEL_OK")
</pallas_src>

<mosaic_0001>
module attributes {stable_mosaic.version = 11 : i64} {
  func.func @patch_embed_kernel(%arg0: i32, %arg1: memref<1x32x16xf32, #tpu.memory_space<vmem>>, %arg2: memref<1x32xf32, #tpu.memory_space<vmem>>, %arg3: memref<17x32xf32, #tpu.memory_space<vmem>>, %arg4: memref<1x17x32xf32, #tpu.memory_space<vmem>>) attributes {dimension_semantics = [#tpu.dimension_semantics<parallel>], iteration_bounds = array<i64: 2>, scalar_prefetch = 0 : i64, scratch_operands = 0 : i64, tpu.core_type = #tpu.core_type<tc>, window_params = [{transform_indices = @transform_0, window_bounds = array<i64: 1, 32, 16>}, {pipeline_mode = #tpu.pipeline_mode<synchronous>, transform_indices = @transform_1, window_bounds = array<i64: 1, 32>}, {pipeline_mode = #tpu.pipeline_mode<synchronous>, transform_indices = @transform_2, window_bounds = array<i64: 17, 32>}, {transform_indices = @transform_3, window_bounds = array<i64: 1, 17, 32>}]} {
    %c0 = arith.constant 0 : index
    %c0_0 = arith.constant 0 : index
    %0 = vector.load %arg3[%c0, %c0_0] : memref<17x32xf32, #tpu.memory_space<vmem>>, vector<17x32xf32>
    %c0_1 = arith.constant 0 : index
    %c0_2 = arith.constant 0 : index
    %c0_3 = arith.constant 0 : index
    %1 = vector.load %arg1[%c0_1, %c0_2, %c0_3] : memref<1x32x16xf32, #tpu.memory_space<vmem>>, vector<1x32x16xf32>
    %2 = tpu.transpose %1, [0, 2, 1] : vector<1x32x16xf32> -> vector<1x16x32xf32>
    %c0_4 = arith.constant 0 : index
    %c0_5 = arith.constant 0 : index
    %3 = vector.load %arg2[%c0_4, %c0_5] : memref<1x32xf32, #tpu.memory_space<vmem>>, vector<1x32xf32>
    %4 = vector.extract_strided_slice %0 {offsets = [0, 0], sizes = [1, 32], strides = [1, 1]} : vector<17x32xf32> to vector<1x32xf32>
    %5 = arith.addf %3, %4 : vector<1x32xf32>
    %6 = vector.shape_cast %5 : vector<1x32xf32> to vector<1x1x32xf32>
    %7 = vector.extract_strided_slice %0 {offsets = [1, 0], sizes = [16, 32], strides = [1, 1]} : vector<17x32xf32> to vector<16x32xf32>
    %8 = vector.shape_cast %7 : vector<16x32xf32> to vector<1x16x32xf32>
    %9 = arith.addf %2, %8 : vector<1x16x32xf32>
    %10 = tpu.concatenate %6, %9 in 1 : vector<1x1x32xf32>, vector<1x16x32xf32> -> vector<1x17x32xf32>
    %c0_6 = arith.constant 0 : index
    %c0_7 = arith.constant 0 : index
    %c0_8 = arith.constant 0 : index
    %11 = vector.load %arg4[%c0_6, %c0_7, %c0_8] : memref<1x17x32xf32, #tpu.memory_space<vmem>>, vector<1x17x32xf32>
    tpu.vector_store %arg4[%c0_6, %c0_7, %c0_8], %10 {strides = array<i32>} : memref<1x17x32xf32, #tpu.memory_space<vmem>>, vector<1x17x32xf32>,
    return
  }
  func.func @transform_0(%arg0: i32) -> (i32, i32, i32) {
    %c0_i32 = arith.constant 0 : i32
    %c0_i32_0 = arith.constant 0 : i32
    %c0_i32_1 = arith.constant 0 : i32
    return %arg0, %c0_i32, %c0_i32_0 : i32, i32, i32
  }
  func.func @transform_1(%arg0: i32) -> (i32, i32) {
    %c0_i32 = arith.constant 0 : i32
    %c0_i32_0 = arith.constant 0 : i32
    %c0_i32_1 = arith.constant 0 : i32
    return %c0_i32, %c0_i32_0 : i32, i32
  }
  func.func @transform_2(%arg0: i32) -> (i32, i32) {
    %c0_i32 = arith.constant 0 : i32
    %c0_i32_0 = arith.constant 0 : i32
    %c0_i32_1 = arith.constant 0 : i32
    return %c0_i32, %c0_i32_0 : i32, i32
  }
  func.func @transform_3(%arg0: i32) -> (i32, i32, i32) {
    %c0_i32 = arith.constant 0 : i32
    %c0_i32_0 = arith.constant 0 : i32
    %c0_i32_1 = arith.constant 0 : i32
    return %arg0, %c0_i32, %c0_i32_0 : i32, i32, i32
  }
}

</mosaic_0001>

<bundles_post_ra>
// kernel: patch_embedding.1
= control target key start
LH: loop header
LB: loop body
LE: loop exit
PB: predicated region body
PF: predicated region fallthrough
CT: control target
= control target key end

     0   :  { %s344_s12 = smov 0   ;;  %s373_s0 = inlined_call_operand.vmem [shape: f32[2,32,16], index: 0, kind: input, shape index: {}]   ;;  %s374_s1 = inlined_call_operand.vmem [shape: f32[1,32], index: 1, kind: input, shape index: {}]   ;;  %s375_s2 = inlined_call_operand.vmem [shape: f32[17,32], index: 2, kind: input, shape index: {}]   ;;  %s376_s3 = inlined_call_operand.vmem [shape: f32[2,17,32], index: 3, kind: output, shape index: {}]  }
   0x1 LB: > { %s295_s13 = sadd.s32 4294967295, %s322_s12   ;;  %p299_p0 = scmp.ge.s32.totalorder %s322_s12, 1  ;;  %s322_s12 = sphi %s344_s12, %s13_s12  }
   0x2   : > { %p137_p1 = scmp.lt.s32.totalorder %s322_s12, 3 }
   0x4   : > { %p138_p2 = pnand %p299_p0, %p137_p1 }
   0x5   : > { %p161_p3 = scmp.lt.s32.totalorder (!%p138_p2), %s295_s13, 1 }
   0x6   : > { %141 = sbr.rel (%p138_p2) target bundleno = 150 (0x96), region = 32 }
   0xb   : > { %s378_s13 = smov (!%p161_p3, %s295_s13), 1  ;;  %v171_v4 = vld [vmem:[%s375_s2] sm:$0xff]  ;;  %v172_v5 = vld [vmem:[%s375_s2 + $0x8] sm:$0xff]  ;;  %vm215_vm0 = vcmask 1046528   ;;  %v173_v8 = vld [vmem:[%s375_s2 + $0x10] sm:$0x1] }
   0xc   : > { %s305_s14 = sshll.u32 %s378_s13, 5  ;;  %v216_v6 = vrot.slane %v171_v4, 1  ;;  %v217_v7 = vrot.slane %v172_v5, 1  ;;  %v210_v9 = vld [vmem:[%s374_s1] sm:$0x1]  ;;  %v219_v11 = vrot.slane %v173_v8, 1 }
   0xd   : > { %s165_s17 = scalar_lea.vmem %s373_s0, %s305_s14  ;;  %s306_s26 = smul.u32 24, %s378_s13  ;;  %v211_v13 = vadd.f32 %v210_v9, %v171_v4  ;;  %vm227_vm1 = vcmask 1040384   ;;  %vm235_vm2 = vcmask 261120   ;;  %vm238_vm3 = vcmask 253952  }
   0xe   : > { %v174_v0 = vld [vmem:[%s165_s17] sm:$0xff]  ;;  %v175_v1 = vld [vmem:[%s165_s17 + $0x8] sm:$0xff]  ;;  %v176_v2 = vld [vmem:[%s165_s17 + $0x10] sm:$0xff]  ;;  %v218_v10 = vsel %vm215_vm0, %v216_v6, %v217_v7  ;;  %v220_v15 = vsel %vm215_vm0, %v217_v7, %v219_v11 }
   0xf   : > { %178 = vxpose.xlu0.b32.start [1/4] (short) (narrow) %v174_v0, 16  ;;  %v177_v3 = vld [vmem:[%s165_s17 + $0x18] sm:$0xff]  ;;  %s170_s29 = scalar_lea.vmem %s376_s3, %s306_s26 }
  0x13   : > { %179 = vxpose.xlu0.b32.cont [2/4] (short) (narrow) %v175_v1, 16 }
  0x17   : > { %180 = vxpose.xlu0.b32.cont [3/4] (short) (narrow) %v176_v2, 16 }
  0x1b   : > { %181 = vxpose.xlu0.b32.end [4/4] (short) (narrow) %v177_v3, 16 }
  0x8b   : > { %v194_v12 = vpop.trf.xlu0 }
  0x8c   : > { %v223_v14 = vadd.f32 %v218_v10, %v194_v12 }
  0x8e   : > { %v228_v16 = vrot.slane %v223_v14, 7 }
  0x8f   : > { %v195_v17 = vpop.trf.xlu0 }
  0x90   : > { %v234_v18 = vsel %vm227_vm1, %v211_v13, %v228_v16  ;;  %v224_v19 = vadd.f32 %v220_v15, %v195_v17 }
  0x91   : > { %236 = vst.msk [vmem:[%s170_s29] sm:$0xff] %vm235_vm2, %v234_v18 }
  0x92   : > { %v229_v20 = vrot.slane %v224_v19, 7 }
  0x94   : > { %v230_v21 = vsel %vm227_vm1, %v228_v16, %v229_v20  ;;  %239 = vst.msk [vmem:[%s170_s29 + $0x10] sm:$0x1] %vm238_vm3, %v229_v20 }
  0x95   : > { %237 = vst.msk [vmem:[%s170_s29 + $0x8] sm:$0xff] %vm235_vm2, %v230_v21 }
  0x96 PF: > { %s13_s12 = sadd.s32 1, %s322_s12  }
  0x97   : > { %p10_p4 = scmp.ge.s32.totalorder %s13_s12, 4  }
  0x99   :  { %12 = sbr.rel (!%p10_p4) target bundleno = 1 (0x1), region = 62 }

</bundles_post_ra>
